<compile_context>
chip_gen: v7x
topology: tpu7x:2x2x1
jax: 0.10.0
libtpu: 0.0.40
codegen_flags: <defaults>
</compile_context>

<pallas_src>
import jax
import jax.numpy as jnp
from jax.experimental import pallas as pl
from jax.experimental.pallas import tpu as pltpu


def se_attention_kernel(x_ref, w1_ref, b1_ref, w2_ref, b2_ref, o_ref):
    # x stays in its native dtype so bf16 inputs take the bf16 MXU path; accumulation
    # is forced to f32 via preferred_element_type.
    x = x_ref[...]

    # fc1: (TB, E) @ (E, H) + (1, H), then LeakyReLU (PyTorch default negative_slope = 0.01).
    h = jnp.dot(x, w1_ref[...], preferred_element_type=jnp.float32)
    h = h + b1_ref[...].astype(jnp.float32)
    h = jnp.where(h > 0, h, 0.01 * h)

    # fc2: (TB, H) @ (H, E) + (1, E)
    z = jnp.dot(h, w2_ref[...], preferred_element_type=jnp.float32)
    z = z + b2_ref[...].astype(jnp.float32)

    # Exact, numerically-stable sigmoid: one EUP tanh + one VALU FMA.
    gate = 0.5 * jnp.tanh(0.5 * z) + 0.5

    # Gate in the input dtype (bf16-native VALU on v6e/v7x); exact no-op cast for f32.
    o_ref[...] = (x * gate.astype(x.dtype)).astype(o_ref.dtype)


def _round_down(n, m):
    return (n // m) * m


def _round_up(n, m):
    return -(-n // m) * m


def se_attention(x, w1, b1, w2, b2, *, block_b=None, target_tile_bytes=2 << 20):
    """SE attention over a (B, E) feature matrix, tiled along the batch axis."""
    B, E = x.shape
    H = w1.shape[1]

    # Sub-32-bit dtypes pack along sublanes: round batch tiles to 8 (f32) / 16 (bf16) /
    # 32 (int8/fp8) rows so the x loads and output stores stay unmasked.
    sub = 8 * max(1, 4 // x.dtype.itemsize)
    bytes_per_row = E * x.dtype.itemsize

    if block_b is None:
        # Byte-targeted tile: ~target_tile_bytes of streamed x per grid step.
        block_b = max(sub, _round_down(target_tile_bytes // bytes_per_row, sub))

    if block_b >= B:
        if B > sub:
            # Whole batch would fit in one tile: split into >=2 steps so v7x megacore can
            # shard the batch axis and the pipeliner can overlap DMA with compute.
            half = -(-B // 2)
            block_b = max(sub, _round_up(half, sub))
        else:
            # Tiny batch: a single full-extent block (legal even when B % sub != 0).
            block_b = B
    else:
        block_b = max(sub, _round_down(block_b, sub))

    num_blocks = pl.cdiv(B, block_b)
    # Ragged B (last partial block) is handled by Pallas boundary masking: pad-region reads
    # only feed dead rows and stores past B are masked -- no jnp.pad / out[:B] round-trip.

    # VMEM budget: double-buffered in + out tiles, f32 in-kernel temporaries (h/z/gate/x*gate),
    # and the resident weights.  Pass it explicitly so enlarged tiles never silently spill
    # (v5e's default scoped VMEM is 16 MiB; v6e/v7x default to 32 MiB).
    tile_bytes = block_b * bytes_per_row
    f32_tile_bytes = block_b * E * 4
    w_bytes = (E * H + H + H * E + E) * w1.dtype.itemsize
    vmem_estimate = 4 * tile_bytes + 4 * f32_tile_bytes + 2 * w_bytes + (2 << 20)
    vmem_limit = int(min(64 << 20, max(vmem_estimate, 32 << 20)))

    return pl.pallas_call(
        se_attention_kernel,
        out_shape=jax.ShapeDtypeStruct((B, E), x.dtype),
        grid=(num_blocks,),
        in_specs=[
            pl.BlockSpec((block_b, E), lambda i: (i, 0)),  # x: streamed per batch tile
            pl.BlockSpec((E, H), lambda i: (0, 0)),        # w1: resident across the grid
            pl.BlockSpec((1, H), lambda i: (0, 0)),        # b1
            pl.BlockSpec((H, E), lambda i: (0, 0)),        # w2
            pl.BlockSpec((1, E), lambda i: (0, 0)),        # b2
        ],
        out_specs=pl.BlockSpec((block_b, E), lambda i: (i, 0)),
        compiler_params=pltpu.CompilerParams(
            dimension_semantics=("parallel",),  # independent batch tiles -> megacore shardable
            vmem_limit_bytes=vmem_limit,
        ),
    )(x, w1, b1, w2, b2)


def init_params(key, embed_dim, reduction=8, dtype=jnp.float32):
    """Deterministic init mimicking nn.Linear default (uniform +/- 1/sqrt(fan_in))."""
    hidden = embed_dim // reduction
    k1, k2, k3, k4 = jax.random.split(key, 4)
    bound1 = 1.0 / jnp.sqrt(embed_dim)
    bound2 = 1.0 / jnp.sqrt(hidden)
    # Stored as (in, out): forward uses x @ W, equivalent to PyTorch x @ W.T.
    w1 = jax.random.uniform(k1, (embed_dim, hidden), dtype, -bound1, bound1)
    b1 = jax.random.uniform(k2, (1, hidden), dtype, -bound1, bound1)
    w2 = jax.random.uniform(k3, (hidden, embed_dim), dtype, -bound2, bound2)
    b2 = jax.random.uniform(k4, (1, embed_dim), dtype, -bound2, bound2)
    return w1, b1, w2, b2


def se_attention_ref(x, w1, b1, w2, b2):
    """Pure-JAX reference for correctness checking."""
    h = x @ w1 + b1
    h = jnp.where(h > 0, h, 0.01 * h)
    z = h @ w2 + b2
    return x * jax.nn.sigmoid(z)


if __name__ == "__main__":
    key = jax.random.PRNGKey(0)
    k_x, k_p = jax.random.split(key)

    # Small but lane-dense test problem: E is a multiple of 128 (unmasked output stores);
    # the heuristic splits B=16 into a 2-step batch grid (exercises pipelining / megacore).
    batch, embed_dim, reduction = 16, 128, 8
    x = jax.random.normal(k_x, (batch, embed_dim), jnp.float32)
    w1, b1, w2, b2 = init_params(k_p, embed_dim, reduction)

    out = se_attention(x, w1, b1, w2, b2)
    out = jax.block_until_ready(out)

    ref = se_attention_ref(x, w1, b1, w2, b2)
    assert out.shape == (batch, embed_dim)
    # Tolerance covers MXU f32-via-bf16-pass accumulation differences vs the XLA reference.
    assert jnp.allclose(out, ref, atol=2e-3, rtol=2e-3), "mismatch vs JAX reference"

    print("KERNEL_OK")
</pallas_src>

<mosaic_0001>
module attributes {stable_mosaic.version = 11 : i64} {
  func.func @se_attention_kernel(%arg0: i32, %arg1: memref<8x128xf32, #tpu.memory_space<vmem>>, %arg2: memref<128x16xf32, #tpu.memory_space<vmem>>, %arg3: memref<1x16xf32, #tpu.memory_space<vmem>>, %arg4: memref<16x128xf32, #tpu.memory_space<vmem>>, %arg5: memref<1x128xf32, #tpu.memory_space<vmem>>, %arg6: memref<8x128xf32, #tpu.memory_space<vmem>>) attributes {dimension_semantics = [#tpu.dimension_semantics<parallel>], iteration_bounds = array<i64: 2>, scalar_prefetch = 0 : i64, scratch_operands = 0 : i64, tpu.core_type = #tpu.core_type<tc>, window_params = [{transform_indices = @transform_0, window_bounds = array<i64: 8, 128>}, {pipeline_mode = #tpu.pipeline_mode<synchronous>, transform_indices = @transform_1, window_bounds = array<i64: 128, 16>}, {pipeline_mode = #tpu.pipeline_mode<synchronous>, transform_indices = @transform_2, window_bounds = array<i64: 1, 16>}, {pipeline_mode = #tpu.pipeline_mode<synchronous>, transform_indices = @transform_3, window_bounds = array<i64: 16, 128>}, {pipeline_mode = #tpu.pipeline_mode<synchronous>, transform_indices = @transform_4, window_bounds = array<i64: 1, 128>}, {transform_indices = @transform_5, window_bounds = array<i64: 8, 128>}]} {
    %c0 = arith.constant 0 : index
    %c0_0 = arith.constant 0 : index
    %0 = vector.load %arg1[%c0, %c0_0] : memref<8x128xf32, #tpu.memory_space<vmem>>, vector<8x128xf32>
    %c0_1 = arith.constant 0 : index
    %c0_2 = arith.constant 0 : index
    %1 = vector.load %arg2[%c0_1, %c0_2] : memref<128x16xf32, #tpu.memory_space<vmem>>, vector<128x16xf32>
    %cst = arith.constant dense<0.000000e+00> : vector<8x16xf32>
    %2 = tpu.matmul %0, %1, %cst {dimension_numbers = #tpu.dot_dimension_numbers<[1], [0], [0], [1], [0, 0, 1, 1], [], []>} : vector<8x128xf32>, vector<128x16xf32>, vector<8x16xf32> -> vector<8x16xf32>
    %c0_3 = arith.constant 0 : index
    %c0_4 = arith.constant 0 : index
    %3 = vector.load %arg3[%c0_3, %c0_4] : memref<1x16xf32, #tpu.memory_space<vmem>>, vector<1x16xf32>
    %4 = vector.broadcast %3 : vector<1x16xf32> to vector<8x16xf32>
    %5 = arith.addf %2, %4 : vector<8x16xf32>
    %cst_5 = arith.constant 0.000000e+00 : f32
    %6 = vector.broadcast %cst_5 : f32 to vector<8x16xf32>
    %7 = arith.cmpf ogt, %5, %6 : vector<8x16xf32>
    %cst_6 = arith.constant 0.00999999977 : f32
    %8 = vector.broadcast %cst_6 : f32 to vector<8x16xf32>
    %9 = arith.mulf %8, %5 : vector<8x16xf32>
    %10 = arith.select %7, %5, %9 : vector<8x16xi1>, vector<8x16xf32>
    %c0_7 = arith.constant 0 : index
    %c0_8 = arith.constant 0 : index
    %11 = vector.load %arg4[%c0_7, %c0_8] : memref<16x128xf32, #tpu.memory_space<vmem>>, vector<16x128xf32>
    %cst_9 = arith.constant dense<0.000000e+00> : vector<8x128xf32>
    %12 = tpu.matmul %10, %11, %cst_9 {dimension_numbers = #tpu.dot_dimension_numbers<[1], [0], [0], [1], [0, 0, 1, 1], [], []>} : vector<8x16xf32>, vector<16x128xf32>, vector<8x128xf32> -> vector<8x128xf32>
    %c0_10 = arith.constant 0 : index
    %c0_11 = arith.constant 0 : index
    %13 = vector.load %arg5[%c0_10, %c0_11] : memref<1x128xf32, #tpu.memory_space<vmem>>, vector<1x128xf32>
    %14 = vector.broadcast %13 : vector<1x128xf32> to vector<8x128xf32>
    %15 = arith.addf %12, %14 : vector<8x128xf32>
    %cst_12 = arith.constant 5.000000e-01 : f32
    %16 = vector.broadcast %cst_12 : f32 to vector<8x128xf32>
    %17 = arith.mulf %16, %15 : vector<8x128xf32>
    %18 = math.tanh %17 : vector<8x128xf32>
    %cst_13 = arith.constant 5.000000e-01 : f32
    %19 = vector.broadcast %cst_13 : f32 to vector<8x128xf32>
    %20 = arith.mulf %19, %18 : vector<8x128xf32>
    %cst_14 = arith.constant 5.000000e-01 : f32
    %21 = vector.broadcast %cst_14 : f32 to vector<8x128xf32>
    %22 = arith.addf %20, %21 : vector<8x128xf32>
    %23 = arith.mulf %0, %22 : vector<8x128xf32>
    %c0_15 = arith.constant 0 : index
    %c0_16 = arith.constant 0 : index
    %24 = vector.load %arg6[%c0_15, %c0_16] : memref<8x128xf32, #tpu.memory_space<vmem>>, vector<8x128xf32>
    tpu.vector_store %arg6[%c0_15, %c0_16], %23 {strides = array<i32>} : memref<8x128xf32, #tpu.memory_space<vmem>>, vector<8x128xf32>,
    return
  }
  func.func @transform_0(%arg0: i32) -> (i32, i32) {
    %c0_i32 = arith.constant 0 : i32
    %c0_i32_0 = arith.constant 0 : i32
    return %arg0, %c0_i32 : i32, i32
  }
  func.func @transform_1(%arg0: i32) -> (i32, i32) {
    %c0_i32 = arith.constant 0 : i32
    %c0_i32_0 = arith.constant 0 : i32
    %c0_i32_1 = arith.constant 0 : i32
    return %c0_i32, %c0_i32_0 : i32, i32
  }
  func.func @transform_2(%arg0: i32) -> (i32, i32) {
    %c0_i32 = arith.constant 0 : i32
    %c0_i32_0 = arith.constant 0 : i32
    %c0_i32_1 = arith.constant 0 : i32
    return %c0_i32, %c0_i32_0 : i32, i32
  }
  func.func @transform_3(%arg0: i32) -> (i32, i32) {
    %c0_i32 = arith.constant 0 : i32
    %c0_i32_0 = arith.constant 0 : i32
    %c0_i32_1 = arith.constant 0 : i32
    return %c0_i32, %c0_i32_0 : i32, i32
  }
  func.func @transform_4(%arg0: i32) -> (i32, i32) {
    %c0_i32 = arith.constant 0 : i32
    %c0_i32_0 = arith.constant 0 : i32
    %c0_i32_1 = arith.constant 0 : i32
    return %c0_i32, %c0_i32_0 : i32, i32
  }
  func.func @transform_5(%arg0: i32) -> (i32, i32) {
    %c0_i32 = arith.constant 0 : i32
    %c0_i32_0 = arith.constant 0 : i32
    return %arg0, %c0_i32 : i32, i32
  }
}

</mosaic_0001>

<bundles_post_ra>
// kernel: tpu_custom_call.1
= control target key start
LH: loop header
LB: loop body
LE: loop exit
PB: predicated region body
PF: predicated region fallthrough
CT: control target
= control target key end

     0   :  { %10 = vsyncpa [#allocation3], 0  ;;  %s883_s0 = inlined_call_operand.vmem [shape: f32[16,128], index: 0, kind: input, shape index: {}]   ;;  %s884_s1 = inlined_call_operand.vmem [shape: f32[128,16], index: 1, kind: input, shape index: {}]   ;;  %s885_s2 = inlined_call_operand.vmem [shape: f32[1,16], index: 2, kind: input, shape index: {}]   ;;  %s886_s3 = inlined_call_operand.vmem [shape: f32[16,128], index: 3, kind: input, shape index: {}]   ;;  %s887_s4 = inlined_call_operand.vmem [shape: f32[1,128], index: 4, kind: input, shape index: {}]   ;;  %s888_s5 = inlined_call_operand.hbm [shape: f32[16,128], index: 5, kind: output, shape index: {}]  }
   0x1   :  { %12 = vsyncpa [#allocation3 + $0x1], 0  ;;  %s723_s18 = smov 0   ;;  %s725_s19 = smov 0  }
   0x2   :  { %s727_s20 = smov 0   ;;  %s729_s21 = smov 0  }
   0x3 LB: > { %s744_s22 = sadd.s32 4294967295, %s687_s21   ;;  %s479_s23 = sadd.s32 4294967294, %s687_s21   ;;  %s687_s21 = sphi %s729_s21, %s894_s21   ;;  %s683_s20 = sphi %s727_s20, %s893_s20   ;;  %s679_s19 = sphi %s725_s19, %s892_s19   ;;  %s675_s18 = sphi %s723_s18, %s891_s18  }
   0x4   : > { %s748_s24 = sadd.s32 1, %s687_s21   ;;  %s135_s25 = sadd.s32 1, %s683_s20 }
   0x5   : > { %s132_s26 = ssub.s32 %s687_s21, %s748_s24  ;;  %p145_p0 = scmp.ne.s32.totalorder %s683_s20, %s679_s19 }
   0x6   : > { %p133_p1 = scmp.eq.s32.totalorder %s132_s26, 0  ;;  %p146_p2 = scmp.eq.s32.totalorder %s744_s22, 1 }
   0x7   : > { %p151_p3 = scmp.ne.s32.totalorder %s679_s19, %s675_s18  ;;  %p152_p4 = scmp.eq.s32.totalorder %s479_s23, 1 }
   0x8   : > { %s759_s27 = scalar_select %p133_p1, %s683_s20, %s135_s25  }
   0x9   : > { %p761_p5 = por %p146_p2, %p145_p0  ;;  %p765_p6 = por %p152_p4, %p151_p3 }
   0xa   : > { %p482_p7 = scmp.ge.s32.totalorder %s687_s21, 1  ;;  %p189_p8 = scmp.lt.s32.totalorder %s687_s21, 3 }
   0xc   : > { %p190_p9 = pnand %p482_p7, %p189_p8 }
   0xd   : > { %v221_v0 = vld [vmem:[%s884_s1] sm:$0xff] (!%p190_p9)  ;;  %v222_v1 = vld [vmem:[%s884_s1 + $0x8] sm:$0xff] (!%p190_p9)  ;;  %v223_v2 = vld [vmem:[%s884_s1 + $0x10] sm:$0xff] (!%p190_p9)  ;;  %v689_v3 = vmov (!%p190_p9), 0.0|0.0   ;;  %vm690_vm0 = vmmov (!%p190_p9), 0   ;;  %v691_v6 = vmov (!%p190_p9), 0.0  }
   0xe   : > { %193 = sbr.rel (%p190_p9) target bundleno = 511 (0x1ff), region = 40  ;;  %554 = vmatprep.subr.bf16.mxu0 (!%p190_p9), %v689_v3  ;;  %v555_v4 = vpack.c.bf16 (!%p190_p9), %v222_v1, %v221_v0  ;;  %v224_v5 = vld [vmem:[%s884_s1 + $0x18] sm:$0xff] (!%p190_p9)  ;;  %544 = vmatprep.mubr.msk.f32.mxu0 (!%p190_p9), %vm690_vm0, %v691_v6  ;;  %v225_v8 = vld [vmem:[%s884_s1 + $0x20] sm:$0xff] (!%p190_p9)  ;;  %v226_v9 = vld [vmem:[%s884_s1 + $0x28] sm:$0xff] (!%p190_p9)  ;;  %p216_p10 = scmp.lt.s32.totalorder (!%p190_p9), %s744_s22, 1  ;;  %vm326_vm2 = vcmask (!%p190_p9), 130048  }
   0xf   : > { %578 = vmatprep.subr.bf16.mxu1 (!%p190_p9), %v689_v3  ;;  %551 = vmatprep.mubr.msk.f32.mxu1 (!%p190_p9), %vm690_vm0, %v691_v6  ;;  %v558_v7 = vpack.c.bf16 (!%p190_p9), %v224_v5, %v223_v2  ;;  %v561_v10 = vpack.c.bf16 (!%p190_p9), %v226_v9, %v225_v8  ;;  %v227_v11 = vld [vmem:[%s884_s1 + $0x30] sm:$0xff] (!%p190_p9)  ;;  %v228_v12 = vld [vmem:[%s884_s1 + $0x38] sm:$0xff] (!%p190_p9)  ;;  %v229_v14 = vld [vmem:[%s884_s1 + $0x40] sm:$0xff] (!%p190_p9)  ;;  %s213_s23 = sand.u32 (!%p190_p9), 1, %s679_s19   ;;  %s489_s26 = sshll.u32 (!%p190_p9), %s744_s22, 7 }
  0x10   : > { %556 = vmatpush3.bf16.msra.mxu0 (!%p190_p9), %v555_v4  ;;  %v564_v13 = vpack.c.bf16 (!%p190_p9), %v228_v12, %v227_v11  ;;  %v230_v15 = vld [vmem:[%s884_s1 + $0x48] sm:$0xff] (!%p190_p9)  ;;  %v231_v17 = vld [vmem:[%s884_s1 + $0x50] sm:$0xff] (!%p190_p9)  ;;  %v232_v18 = vld [vmem:[%s884_s1 + $0x58] sm:$0xff] (!%p190_p9)  ;;  %s483_s25 = sshll.u32 (!%p190_p9), %s213_s23, 3  ;;  %s407_s10 = scalar_lea.sflag (!%p190_p9), [#allocation3], %s213_s23 }
  0x11   : > { %557 = vmatprep.subr.bf16.mxu0 (!%p190_p9), %v689_v3  ;;  %v567_v16 = vpack.c.bf16 (!%p190_p9), %v230_v15, %v229_v14  ;;  %v570_v19 = vpack.c.bf16 (!%p190_p9), %v232_v18, %v231_v17  ;;  %v233_v20 = vld [vmem:[%s884_s1 + $0x60] sm:$0xff] (!%p190_p9)  ;;  %v234_v21 = vld [vmem:[%s884_s1 + $0x68] sm:$0xff] (!%p190_p9)  ;;  %v235_v23 = vld [vmem:[%s884_s1 + $0x70] sm:$0xff] (!%p190_p9)  ;;  %s215_s30 = scalar_lea.vmem (!%p190_p9), [#allocation2], %s483_s25 }
  0x12   : > { %v573_v22 = vpack.c.bf16 (!%p190_p9), %v234_v21, %v233_v20  ;;  %v236_v24 = vld [vmem:[%s884_s1 + $0x78] sm:$0xff] (!%p190_p9)  ;;  %v317_v27 = vld [vmem:[%s886_s3] sm:$0xff] (!%p190_p9)  ;;  %v318_v28 = vld [vmem:[%s886_s3 + $0x8] sm:$0xff] (!%p190_p9) }
  0x13   : > { %v576_v25 = vpack.c.bf16 (!%p190_p9), %v236_v24, %v235_v23  ;;  %v579_v29 = vpack.c.bf16 (!%p190_p9), %v318_v28, %v317_v27  ;;  %v485_v30 = vld [vmem:[%s885_s2] ss:$0 sm:$0xff] (!%p190_p9) }
  0x14   : > { %559 = vmatpush3.bf16.msra.mxu0 (!%p190_p9), %v558_v7  ;;  %v486_v36 = vld [vmem:[%s887_s4] ss:$0 sm:$0xff] (!%p190_p9) }
  0x15   : > { %560 = vmatprep.subr.bf16.mxu0 %v689_v3  ;;  %s217_s17 = scalar_select %p216_p10, %s744_s22, 1  ;;  %580 = vmatpush3.bf16.msra.mxu1 %v579_v29 }
  0x16   : > { %s692_s22 = smov [#allocation2]  }
  0x17   : > { %s484_s6 = sshll.u32 %s217_s17, 3  ;;  %s629_s12 = sshll.u32 %s692_s22, 4  ;;  %s630_s12 = int_to_ptr.vmem [resolvable:$false] %s629_s12 }
  0x18   : > { %562 = vmatpush3.bf16.msra.mxu0 %v561_v10  ;;  %s219_s9 = scalar_lea.vmem %s883_s0, %s484_s6  ;;  %s420_s6 = sshll.u32 %s215_s30, 4  ;;  %s843_s6 = int_to_ptr.vmem [resolvable:$true] %s420_s6 }
  0x19   : > { %563 = vmatprep.subr.bf16.mxu0 %v689_v3  ;;  %v220_v26 = vld [vmem:[%s219_s9] sm:$0xff]  ;;  %s841_s9 = scalar_lea.hbm %s888_s5, %s489_s26  ;;  %s625_s11 = scalar_lea.vmem %s843_s6, 128 }
  0x1a   : > { %p626_p11 = scmp.ne.s32.totalorder %s843_s6, %s625_s11  ;;  %s631_s13 = scalar_lea.vmem %s630_s12, 256 }
  0x1b   : > { %p632_p0 = scmp.lt.s32.totalorder %s843_s6, %s630_s12  ;;  %p633_p1 = scmp.lt.s32.totalorder %s631_s13, %s625_s11 }
  0x1c   : > { %565 = vmatpush3.bf16.msra.mxu0 %v564_v13  ;;  %p627_p12 = pnand %p626_p11, %p761_p5 }
  0x1d   : > { %566 = vmatprep.subr.bf16.mxu0 %v689_v3  ;;  %p634_p2 = por %p633_p1, %p632_p0 }
  0x1e   : > { %p628_p13 = pneg %p627_p12 }
  0x20   : > { %568 = vmatpush3.bf16.msra.mxu0 %v567_v16  ;;  %p635_p3 = pnand %p634_p2, %p628_p13 }
  0x21   : > { %569 = vmatprep.subr.bf16.mxu0 %v689_v3 }
  0x24   : > { %571 = vmatpush3.bf16.msra.mxu0 %v570_v19 }
  0x25   : > { %572 = vmatprep.subr.bf16.mxu0 %v689_v3 }
  0x28   : > { %574 = vmatpush3.bf16.msra.mxu0 %v573_v22 }
  0x29   : > { %575 = vmatprep.subr.bf16.mxu0 %v689_v3 }
  0x2c   : > { %577 = vmatpush3.bf16.msra.mxu0 %v576_v25 }
  0x2f   : > { %545 = vmatmul.mubr.f32.vlgmr.msra.gmra.mrb[0].mxu0 %v220_v26 }
 0x102   : > { %v310_v31 = vpop.f32.mrb[0].mxu0 }
 0x103   : > { %v311_v32 = vadd.f32 %v485_v30, %v310_v31  ;;  %v546_v33 = vpop.f32.mrb[1].mxu0 }
 0x105   : > { %vm314_vm1 = vcmp.gt.f32.partialorder %v311_v32, 0.0  ;;  %v315_v34 = vmul.f32 0.01, %v311_v32 }
 0x107   : > { %v316_v35 = vsel %vm314_vm1, %v311_v32, %v315_v34 }
 0x108   : > { %552 = vmatmul.mubr.msk.f32.vlgmr.msra.gmra.mrb[0].mxu1 %vm326_vm2, %v316_v35 }
 0x1db   : > { %v396_v37 = vpop.f32.mrb[0].mxu1 }
 0x1dc   : > { %v397_v38 = vadd.f32 %v486_v36, %v396_v37  ;;  %v553_v39 = vpop.f32.mrb[1].mxu1 }
 0x1de   : > { %v400_v40 = vmul.f32 0.5, %v397_v38 }
 0x1e0   : > { %623 = vtanh.f32 %v400_v40 }
 0x1ea   : > { %v624_v41 = vpop.eup %623 }
 0x1eb   : > { %v402_v42 = vmul.f32 0.5, %v624_v41 }
 0x1ed   : > { %v403_v43 = vadd.f32 0.5, %v402_v42 }
 0x1ef   : > { %v404_v44 = vmul.f32 %v403_v43, %v220_v26 }
 0x1f1   : > { %405 = vst [vmem:[%s215_s30] sm:$0xff] %v404_v44 }
 0x1f2   : > { %638 = shalt.err (!%p635_p3)
}
 0x1f3   : > { %s639_s14 = scalar_lea.hbm %s841_s9, 128  ;;  %s643_s17 = scalar_lea.hbm %s888_s5, 256 }
 0x1f4   : > { %p640_p4 = scmp.ne.s32.totalorder %s841_s9, %s639_s14  ;;  %p644_p9 = scmp.lt.u32.totalorder %s841_s9, %s888_s5 }
 0x1f5   : > { %p645_p10 = scmp.lt.u32.totalorder %s643_s17, %s639_s14  ;;  %p647_p12 = scmp.lt.u32.totalorder %s639_s14, %s841_s9 }
 0x1f6   : > { %p641_p7 = pnand %p640_p4, %p761_p5 }
 0x1f7   : > { %p646_p11 = por %p645_p10, %p644_p9 }
 0x1f8   : > { %p642_p8 = pneg %p641_p7 }
 0x1f9   : > { %p648_p13 = por %p647_p12, %p646_p11 }
 0x1fb   : > { %p649_p0 = pnand %p648_p13, %p642_p8 }
 0x1fd   : > { %652 = shalt.err (!%p649_p0)
}
 0x1fe   : > { %581 = dma.vmem_to_hbm [thread:$0]  (%p761_p5), %s843_s6, 128, %s841_s9, %s407_s10  }
 0x1ff PF: > { %p587_p1 = scmp.ge.s32.totalorder %s687_s21, 2  ;;  %s432_s26 = sand.u32 1, %s675_s18  }
 0x200   : > { %s433_s30 = scalar_lea.sflag [#allocation3], %s432_s26 }
 0x201   : > { %p584_p2 = pnand %p587_p1, %p765_p6 }
 0x203   : > { %670 = dma.done.wait (!%p584_p2), %s433_s30, 128  }
 0x204   : > { %672 = vsyncadd (!%p584_p2), %s433_s30, 4294967168  ;;  %p15_p3 = scmp.ge.s32.totalorder %s748_s24, 4   ;;  %s891_s18 = smov %s679_s19 }
 0x205   : > { %s892_s19 = smov %s683_s20  ;;  %s893_s20 = smov %s759_s27 }
 0x206   : > { %s894_s21 = smov %s748_s24  ;;  %17 = sbr.rel (!%p15_p3) target bundleno = 3 (0x3), region = 75 }
 0x20d   :  { %438 = vsyncpa [#allocation3], 1 }
 0x20e   :  { %440 = vsyncpa [#allocation3 + $0x1], 1 }

</bundles_post_ra>
